<compile_context>
chip_gen: v7x
topology: tpu7x:2x2x1
jax: 0.10.0
libtpu: 0.0.40
codegen_flags: <defaults>
</compile_context>

<pallas_src>
import jax
import jax.numpy as jnp
import numpy as np
from jax.experimental import pallas as pl
from jax.experimental.pallas import tpu as pltpu

KERNEL = 3
STRIDE = 4
KK = KERNEL * KERNEL
LANE = 128
SUBLANE = 8
_VMEM_BUDGET = 12 * 1024 * 1024  # conservative; fits every generation's scoped VMEM


def _avgpool_kernel(x_ref, o_ref):
    # x_ref: (9, tile_r, 128)   o_ref: (tile_r, 128)
    # 8 unrolled VPU adds (window sum) + one scale; accumulate in f32.
    acc = x_ref[0].astype(jnp.float32)
    for k in range(1, KK):
        acc = acc + x_ref[k].astype(jnp.float32)
    o_ref[...] = (acc * (1.0 / KK)).astype(o_ref.dtype)


def _pick_tile_rows(m, itemsize):
    """Rows (of 128 lanes) per grid step: big as possible under VMEM budget."""
    needed_rows = -(-m // LANE)                       # ceil(m / 128)
    needed_rows = -(-needed_rows // SUBLANE) * SUBLANE  # round up to mult of 8
    # per-element VMEM footprint: double-buffered 9 input planes + output,
    # plus an f32 working accumulator.
    per_elem = 2 * (KK + 1) * itemsize + 4
    budget_rows = max(SUBLANE,
                      (_VMEM_BUDGET // per_elem // LANE) // SUBLANE * SUBLANE)
    return min(needed_rows, budget_rows)


@jax.jit
def fast_branch_forward(x):
    """Equivalent of torch.nn.AvgPool2d(3, stride=4) on an NCHW input."""
    n, c, h, w = x.shape
    ho = (h - KERNEL) // STRIDE + 1
    wo = (w - KERNEL) // STRIDE + 1
    nc = n * c
    m = nc * ho * wo

    # ---- layout plumbing in XLA (fuses into ~one pass over the input) ----
    h_used = (ho - 1) * STRIDE + KERNEL
    w_used = (wo - 1) * STRIDE + KERNEL
    hp, wp = ho * STRIDE, wo * STRIDE
    xf = x.reshape(nc, h, w)[:, :h_used, :w_used]
    xf = jnp.pad(xf, ((0, 0), (0, hp - h_used), (0, wp - w_used)))
    # Windows are disjoint (stride > kernel): expose the 3x3 offsets as
    # leading dims, keep (nc, ho, wo) order intact on the flat axis so the
    # result maps straight back to NCHW with no output transpose.
    xf = xf.reshape(nc, ho, STRIDE, wo, STRIDE)[:, :, :KERNEL, :, :KERNEL]
    xt = jnp.transpose(xf, (2, 4, 0, 1, 3)).reshape(KK, m)   # (9, nc*ho*wo)

    # ---- lane-dense (rows, 128) slab, padded to a whole number of tiles ----
    itemsize = jnp.dtype(x.dtype).itemsize
    tile_r = _pick_tile_rows(m, itemsize)
    chunk = tile_r * LANE
    mp = ((m + chunk - 1) // chunk) * chunk
    if mp != m:
        xt = jnp.pad(xt, ((0, 0), (0, mp - m)))
    rows = mp // LANE
    xt = xt.reshape(KK, rows, LANE)

    grid = (rows // tile_r,)
    out = pl.pallas_call(
        _avgpool_kernel,
        grid=grid,
        in_specs=[pl.BlockSpec((KK, tile_r, LANE), lambda i: (0, i, 0))],
        out_specs=pl.BlockSpec((tile_r, LANE), lambda i: (i, 0)),
        out_shape=jax.ShapeDtypeStruct((rows, LANE), x.dtype),
        compiler_params=pltpu.CompilerParams(
            dimension_semantics=("parallel",),
            vmem_limit_bytes=32 * 1024 * 1024),
    )(xt)

    return out.reshape(mp)[:m].reshape(n, c, ho, wo)


def _reference_avgpool(xn):
    """NumPy reference == torch.nn.AvgPool2d(3, stride=4)."""
    n, c, h, w = xn.shape
    ho = (h - KERNEL) // STRIDE + 1
    wo = (w - KERNEL) // STRIDE + 1
    ref = np.zeros((n, c, ho, wo), dtype=np.float32)
    for oh in range(ho):
        for ow in range(wo):
            win = xn[:, :,
                     oh * STRIDE:oh * STRIDE + KERNEL,
                     ow * STRIDE:ow * STRIDE + KERNEL]
            ref[:, :, oh, ow] = win.mean(axis=(2, 3))
    return ref


if __name__ == "__main__":
    key = jax.random.PRNGKey(0)

    # Primary small case consistent with the module.
    x = jax.random.normal(key, (2, 4, 16, 16), dtype=jnp.float32)
    out = jax.block_until_ready(fast_branch_forward(x))
    ref = _reference_avgpool(np.asarray(x))
    np.testing.assert_allclose(np.asarray(out), ref, rtol=1e-5, atol=1e-5)
    assert out.shape == ref.shape

    # Odd, non-divisible spatial size to exercise cropping / padding / tiling.
    x2 = jax.random.normal(jax.random.PRNGKey(1), (2, 3, 37, 53),
                           dtype=jnp.float32)
    out2 = jax.block_until_ready(fast_branch_forward(x2))
    ref2 = _reference_avgpool(np.asarray(x2))
    np.testing.assert_allclose(np.asarray(out2), ref2, rtol=1e-5, atol=1e-5)
    assert out2.shape == ref2.shape

    print("KERNEL_OK")
</pallas_src>

<mosaic_0001>
module attributes {stable_mosaic.version = 11 : i64} {
  func.func @_avgpool_kernel(%arg0: i32, %arg1: memref<9x8x128xf32, #tpu.memory_space<vmem>>, %arg2: memref<8x128xf32, #tpu.memory_space<vmem>>) attributes {dimension_semantics = [#tpu.dimension_semantics<parallel>], iteration_bounds = array<i64: 1>, scalar_prefetch = 0 : i64, scratch_operands = 0 : i64, tpu.core_type = #tpu.core_type<tc>, window_params = [{transform_indices = @transform_0, window_bounds = array<i64: 9, 8, 128>}, {transform_indices = @transform_1, window_bounds = array<i64: 8, 128>}]} {
    %c0 = arith.constant 0 : index
    %c0_0 = arith.constant 0 : index
    %c0_1 = arith.constant 0 : index
    %0 = vector.load %arg1[%c0, %c0_0, %c0_1] : memref<9x8x128xf32, #tpu.memory_space<vmem>>, vector<1x8x128xf32>
    %1 = vector.shape_cast %0 : vector<1x8x128xf32> to vector<8x128xf32>
    %c1 = arith.constant 1 : index
    %c0_2 = arith.constant 0 : index
    %c0_3 = arith.constant 0 : index
    %2 = vector.load %arg1[%c1, %c0_2, %c0_3] : memref<9x8x128xf32, #tpu.memory_space<vmem>>, vector<1x8x128xf32>
    %3 = vector.shape_cast %2 : vector<1x8x128xf32> to vector<8x128xf32>
    %4 = arith.addf %1, %3 : vector<8x128xf32>
    %c2 = arith.constant 2 : index
    %c0_4 = arith.constant 0 : index
    %c0_5 = arith.constant 0 : index
    %5 = vector.load %arg1[%c2, %c0_4, %c0_5] : memref<9x8x128xf32, #tpu.memory_space<vmem>>, vector<1x8x128xf32>
    %6 = vector.shape_cast %5 : vector<1x8x128xf32> to vector<8x128xf32>
    %7 = arith.addf %4, %6 : vector<8x128xf32>
    %c3 = arith.constant 3 : index
    %c0_6 = arith.constant 0 : index
    %c0_7 = arith.constant 0 : index
    %8 = vector.load %arg1[%c3, %c0_6, %c0_7] : memref<9x8x128xf32, #tpu.memory_space<vmem>>, vector<1x8x128xf32>
    %9 = vector.shape_cast %8 : vector<1x8x128xf32> to vector<8x128xf32>
    %10 = arith.addf %7, %9 : vector<8x128xf32>
    %c4 = arith.constant 4 : index
    %c0_8 = arith.constant 0 : index
    %c0_9 = arith.constant 0 : index
    %11 = vector.load %arg1[%c4, %c0_8, %c0_9] : memref<9x8x128xf32, #tpu.memory_space<vmem>>, vector<1x8x128xf32>
    %12 = vector.shape_cast %11 : vector<1x8x128xf32> to vector<8x128xf32>
    %13 = arith.addf %10, %12 : vector<8x128xf32>
    %c5 = arith.constant 5 : index
    %c0_10 = arith.constant 0 : index
    %c0_11 = arith.constant 0 : index
    %14 = vector.load %arg1[%c5, %c0_10, %c0_11] : memref<9x8x128xf32, #tpu.memory_space<vmem>>, vector<1x8x128xf32>
    %15 = vector.shape_cast %14 : vector<1x8x128xf32> to vector<8x128xf32>
    %16 = arith.addf %13, %15 : vector<8x128xf32>
    %c6 = arith.constant 6 : index
    %c0_12 = arith.constant 0 : index
    %c0_13 = arith.constant 0 : index
    %17 = vector.load %arg1[%c6, %c0_12, %c0_13] : memref<9x8x128xf32, #tpu.memory_space<vmem>>, vector<1x8x128xf32>
    %18 = vector.shape_cast %17 : vector<1x8x128xf32> to vector<8x128xf32>
    %19 = arith.addf %16, %18 : vector<8x128xf32>
    %c7 = arith.constant 7 : index
    %c0_14 = arith.constant 0 : index
    %c0_15 = arith.constant 0 : index
    %20 = vector.load %arg1[%c7, %c0_14, %c0_15] : memref<9x8x128xf32, #tpu.memory_space<vmem>>, vector<1x8x128xf32>
    %21 = vector.shape_cast %20 : vector<1x8x128xf32> to vector<8x128xf32>
    %22 = arith.addf %19, %21 : vector<8x128xf32>
    %c8 = arith.constant 8 : index
    %c0_16 = arith.constant 0 : index
    %c0_17 = arith.constant 0 : index
    %23 = vector.load %arg1[%c8, %c0_16, %c0_17] : memref<9x8x128xf32, #tpu.memory_space<vmem>>, vector<1x8x128xf32>
    %24 = vector.shape_cast %23 : vector<1x8x128xf32> to vector<8x128xf32>
    %25 = arith.addf %22, %24 : vector<8x128xf32>
    %cst = arith.constant 0.111111112 : f32
    %26 = vector.broadcast %cst : f32 to vector<8x128xf32>
    %27 = arith.mulf %25, %26 : vector<8x128xf32>
    %c0_18 = arith.constant 0 : index
    %c0_19 = arith.constant 0 : index
    %28 = vector.load %arg2[%c0_18, %c0_19] : memref<8x128xf32, #tpu.memory_space<vmem>>, vector<8x128xf32>
    tpu.vector_store %arg2[%c0_18, %c0_19], %27 {strides = array<i32>} : memref<8x128xf32, #tpu.memory_space<vmem>>, vector<8x128xf32>,
    return
  }
  func.func @transform_0(%arg0: i32) -> (i32, i32, i32) {
    %c0_i32 = arith.constant 0 : i32
    %c0_i32_0 = arith.constant 0 : i32
    %c0_i32_1 = arith.constant 0 : i32
    return %c0_i32, %arg0, %c0_i32_0 : i32, i32, i32
  }
  func.func @transform_1(%arg0: i32) -> (i32, i32) {
    %c0_i32 = arith.constant 0 : i32
    %c0_i32_0 = arith.constant 0 : i32
    return %arg0, %c0_i32 : i32, i32
  }
}

</mosaic_0001>

<bundles_post_ra>
// kernel: fast_branch_forward.1
= control target key start
LH: loop header
LB: loop body
LE: loop exit
PB: predicated region body
PF: predicated region fallthrough
CT: control target
= control target key end

     0   :  { %s87_s0 = inlined_call_operand.vmem [shape: f32[9,8,128], index: 0, kind: input, shape index: {}]   ;;  %s88_s1 = inlined_call_operand.vmem [shape: f32[8,128], index: 1, kind: output, shape index: {}]  }
   0x1   :  { %v8_v0 = vld [vmem:[%s87_s0] sm:$0xff]  ;;  %v39_v1 = vld [vmem:[%s87_s0 + $0x8] sm:$0xff]  ;;  %v40_v2 = vld [vmem:[%s87_s0 + $0x10] sm:$0xff] }
   0x2   :  { %v11_v3 = vadd.f32 %v39_v1, %v8_v0  ;;  %v41_v4 = vld [vmem:[%s87_s0 + $0x18] sm:$0xff]  ;;  %v42_v6 = vld [vmem:[%s87_s0 + $0x20] sm:$0xff]  ;;  %v43_v8 = vld [vmem:[%s87_s0 + $0x28] sm:$0xff] }
   0x3   :  { %v44_v10 = vld [vmem:[%s87_s0 + $0x30] sm:$0xff]  ;;  %v45_v12 = vld [vmem:[%s87_s0 + $0x38] sm:$0xff]  ;;  %v46_v14 = vld [vmem:[%s87_s0 + $0x40] sm:$0xff] }
   0x4   :  { %v14_v5 = vadd.f32 %v40_v2, %v11_v3 }
   0x6   :  { %v17_v7 = vadd.f32 %v41_v4, %v14_v5 }
   0x8   :  { %v20_v9 = vadd.f32 %v42_v6, %v17_v7 }
   0xa   :  { %v23_v11 = vadd.f32 %v43_v8, %v20_v9 }
   0xc   :  { %v26_v13 = vadd.f32 %v44_v10, %v23_v11 }
   0xe   :  { %v29_v15 = vadd.f32 %v45_v12, %v26_v13 }
  0x10   :  { %v32_v16 = vadd.f32 %v46_v14, %v29_v15 }
  0x12   :  { %v33_v17 = vmul.f32 0.11111111, %v32_v16 }
  0x14   :  { %34 = vst [vmem:[%s88_s1] sm:$0xff] %v33_v17 }

</bundles_post_ra>
